<compile_context>
chip_gen: v5e
topology: v5e:2x2
jax: 0.10.0
libtpu: 0.0.40
codegen_flags: <defaults>
</compile_context>

<pallas_src>
import numpy as np

import jax
import jax.numpy as jnp
from jax.experimental import pallas as pl
from jax.experimental.pallas import tpu as pltpu

EPS = 1e-6          # clamp min used by densepose normalize_embeddings
_LANES = 128
_LANE_DIVISORS = (1, 2, 4, 8, 16, 32, 64, 128)


def _round_up(a: int, b: int) -> int:
    return -(-a // b) * b


def _next_lane_divisor(d: int) -> int:
    for c in _LANE_DIVISORS:
        if c >= d:
            return c
    return d


def _hw_params():
    """Generation-aware (vmem_limit_bytes, per-block byte target, tensorcores)."""
    vmem_cap = None
    try:
        info = pltpu.get_tpu_info()
        vmem_cap = int(getattr(info, "vmem_capacity_bytes", 0)) or None
    except Exception:
        vmem_cap = None
    cores = 1
    try:
        if "v7" in jax.devices()[0].device_kind.lower():
            cores = 2
    except Exception:
        pass
    if vmem_cap is not None and vmem_cap >= (128 << 20):
        # v5e / v6e: 128 MiB physical VMEM -> large blocks, generous limit.
        return 64 << 20, 8 << 20, cores
    # v7x (64 MiB physical VMEM) or unknown backend: conservative but ample.
    # 4 x 7 MiB (in/out x double buffer) stays under the 32 MiB limit.
    return 32 << 20, 7 << 20, cores


def _normalize_rowsum_kernel(x_ref, o_ref):
    # Unpacked path: one logical row per physical row (D >= 128 lanes wide).
    x = x_ref[...].astype(jnp.float32)
    ssum = jnp.sum(x * x, axis=-1, keepdims=True)
    # max(||x||, eps) == sqrt(max(||x||^2, eps^2)); rsqrt runs on the EUP.
    inv = jax.lax.rsqrt(jnp.maximum(ssum, EPS * EPS))
    o_ref[...] = (x * inv).astype(o_ref.dtype)


def _normalize_packed_kernel(x_ref, b_ref, o_ref):
    # Packed path: k = 128/D logical rows per 128-lane physical row.
    # Segment sums computed on the (otherwise idle) MXU with a constant
    # block-diagonal 0/1 matrix.  0/1 weights split exactly, so with
    # precision=HIGHEST this is an f32-accurate segmented reduction.
    x = x_ref[...].astype(jnp.float32)
    sq = x * x
    ssum = jnp.dot(sq, b_ref[...],
                   preferred_element_type=jnp.float32,
                   precision=jax.lax.Precision.HIGHEST)
    inv = jax.lax.rsqrt(jnp.maximum(ssum, EPS * EPS))
    o_ref[...] = (x * inv).astype(o_ref.dtype)


def vertex_direct_embedder_forward(embeddings: jax.Array, *, block_rows: int | None = None) -> jax.Array:
    """Pallas implementation of VertexDirectEmbedder.forward().

    Args:
        embeddings: [N, D] float array (the module's parameter).
        block_rows: optional rows-per-block override (rounded up to a sublane
            multiple, in the packed/physical-row layout).

    Returns:
        [N, D] row-normalized embeddings (same dtype as input).
    """
    n, d = embeddings.shape
    dtype = embeddings.dtype
    itemsize = jnp.dtype(dtype).itemsize
    sublane = max(8, 8 * (4 // itemsize))        # 8 for f32, 16 for bf16, ...

    x = embeddings
    d_work = d

    # Lane-density fix for D < 128 that does not divide 128: pad D up to the
    # nearest divisor of 128 (e.g. 48 -> 64).  Zero columns add nothing to the
    # squared norm and are sliced off at the end.
    if d_work < _LANES and _LANES % d_work != 0:
        d_work = _next_lane_divisor(d_work)
        x = jnp.pad(x, ((0, 0), (0, d_work - d)))

    # Lane packing: k logical rows per 128-lane physical row when D < 128.
    if d_work < _LANES:
        k = _LANES // d_work
        width = _LANES
    else:
        k = 1
        width = d_work

    # Row padding: ONLY to a multiple of k (<= k-1 zero rows; zero rows
    # normalize to zero under the eps clamp and are sliced off).  Never pad to
    # block_rows -- the ragged last block is handled by grid=pl.cdiv below.
    total_rows = x.shape[0]
    if total_rows % k:
        x = jnp.pad(x, ((0, k - total_rows % k), (0, 0)))
        total_rows = x.shape[0]
    rows = total_rows // k
    x = x.reshape(rows, width)                    # free: contiguous row-major

    # Block sizing (generation-aware).
    vmem_limit, block_target, cores = _hw_params()
    row_bytes = width * itemsize
    if block_rows is not None:
        budget_rows = max(sublane, _round_up(int(block_rows), sublane))
    else:
        budget_rows = max(sublane, (block_target // row_bytes) // sublane * sublane)
        # Megacore split only on 2-TC chips, targeting >= 2 steps per core so
        # input DMA overlaps compute; skipped entirely on 1-TC chips.
        if cores > 1 and rows >= cores * 2 * sublane:
            budget_rows = min(budget_rows, _round_up(-(-rows // (cores * 2)), sublane))

    if rows <= budget_rows:
        blk = rows                                # single exact block (full-dim rule)
    else:
        blk = budget_rows                         # sublane-multiple block, ragged tail OK
    grid = (pl.cdiv(rows, blk),)

    x_spec = pl.BlockSpec((blk, width), lambda i: (i, 0))
    o_spec = pl.BlockSpec((blk, width), lambda i: (i, 0))
    out_shape = jax.ShapeDtypeStruct((rows, width), dtype)
    cparams = pltpu.CompilerParams(
        dimension_semantics=("parallel",),
        vmem_limit_bytes=vmem_limit,
    )

    if k > 1:
        # Constant (128, 128) block-diagonal 0/1 matrix: B[j, i] = 1 iff lanes
        # j and i belong to the same length-d_work segment.  64 KiB, resident
        # in VMEM across all grid steps (constant block index).
        b_mat = jnp.asarray(np.kron(np.eye(k, dtype=np.float32),
                                    np.ones((d_work, d_work), dtype=np.float32)))
        b_spec = pl.BlockSpec((width, width), lambda i: (0, 0))
        out = pl.pallas_call(
            _normalize_packed_kernel,
            out_shape=out_shape,
            grid_spec=pltpu.PrefetchScalarGridSpec(
                num_scalar_prefetch=0,
                grid=grid,
                in_specs=[x_spec, b_spec],
                out_specs=o_spec,
            ),
            compiler_params=cparams,
        )(x, b_mat)
    else:
        out = pl.pallas_call(
            _normalize_rowsum_kernel,
            out_shape=out_shape,
            grid_spec=pltpu.PrefetchScalarGridSpec(
                num_scalar_prefetch=0,
                grid=grid,
                in_specs=[x_spec],
                out_specs=o_spec,
            ),
            compiler_params=cparams,
        )(x)

    out = out.reshape(rows * k, d_work)           # free reshape
    if rows * k != n:
        out = out[:n]
    if d_work != d:
        out = out[:, :d]
    return out


def _reference(emb: jax.Array) -> jax.Array:
    norm = jnp.maximum(jnp.linalg.norm(emb, axis=1, keepdims=True), EPS)
    return emb / norm


def init_vertex_direct_embedder(num_vertices: int, embed_dim: int, key) -> jax.Array:
    """Deterministic synthetic parameter init.

    Note: the PyTorch module's reset_parameters() zeroes the embeddings (whose
    forward output would be all zeros after the eps clamp).  To exercise the
    kernel meaningfully we fill the parameter with deterministic random values
    instead (as if `load()` had populated it).
    """
    return jax.random.normal(key, (num_vertices, embed_dim), dtype=jnp.float32)


if __name__ == "__main__":
    key = jax.random.PRNGKey(0)

    # Small shapes consistent with the module: N = 64 vertices, D = 32 dims.
    num_vertices, embed_dim = 64, 32
    embeddings = init_vertex_direct_embedder(num_vertices, embed_dim, key)
    out = jax.block_until_ready(vertex_direct_embedder_forward(embeddings))
    assert out.shape == (num_vertices, embed_dim)
    assert jnp.allclose(out, _reference(embeddings), atol=1e-5, rtol=1e-5)

    # Zero-embedding case (the module's reset_parameters state).
    zeros = jnp.zeros((num_vertices, embed_dim), dtype=jnp.float32)
    out_zero = jax.block_until_ready(vertex_direct_embedder_forward(zeros))
    assert jnp.all(out_zero == 0.0)

    # N not divisible by the packing factor k (exercises the tiny row pad).
    emb2 = jax.random.normal(jax.random.PRNGKey(1), (50, 32), dtype=jnp.float32)
    out2 = jax.block_until_ready(vertex_direct_embedder_forward(emb2))
    assert out2.shape == (50, 32)
    assert jnp.allclose(out2, _reference(emb2), atol=1e-5, rtol=1e-5)

    # D that does not divide 128 (exercises the D-pad -> packed path, 48 -> 64).
    emb3 = jax.random.normal(jax.random.PRNGKey(2), (40, 48), dtype=jnp.float32)
    out3 = jax.block_until_ready(vertex_direct_embedder_forward(emb3))
    assert out3.shape == (40, 48)
    assert jnp.allclose(out3, _reference(emb3), atol=1e-5, rtol=1e-5)

    # Multi-block grid with a ragged last block (grid = cdiv, no block padding).
    emb4 = jax.random.normal(jax.random.PRNGKey(3), (260, 16), dtype=jnp.float32)
    out4 = jax.block_until_ready(vertex_direct_embedder_forward(emb4, block_rows=8))
    assert out4.shape == (260, 16)
    assert jnp.allclose(out4, _reference(emb4), atol=1e-5, rtol=1e-5)

    # Unpacked path: D a multiple of 128 (plain lane reduction, no packing).
    emb5 = jax.random.normal(jax.random.PRNGKey(4), (24, 256), dtype=jnp.float32)
    out5 = jax.block_until_ready(vertex_direct_embedder_forward(emb5))
    assert out5.shape == (24, 256)
    assert jnp.allclose(out5, _reference(emb5), atol=1e-5, rtol=1e-5)

    print("KERNEL_OK")
</pallas_src>

<mosaic_0001>
module attributes {stable_mosaic.version = 11 : i64} {
  func.func @_normalize_packed_kernel(%arg0: i32, %arg1: memref<16x128xf32, #tpu.memory_space<vmem>>, %arg2: memref<128x128xf32, #tpu.memory_space<vmem>>, %arg3: memref<16x128xf32, #tpu.memory_space<vmem>>) attributes {dimension_semantics = [#tpu.dimension_semantics<parallel>], iteration_bounds = array<i64: 1>, scalar_prefetch = 0 : i64, scratch_operands = 0 : i64, tpu.core_type = #tpu.core_type<tc>, window_params = [{transform_indices = @transform_0, window_bounds = array<i64: 16, 128>}, {pipeline_mode = #tpu.pipeline_mode<synchronous>, transform_indices = @transform_1, window_bounds = array<i64: 128, 128>}, {transform_indices = @transform_2, window_bounds = array<i64: 16, 128>}]} {
    %c0 = arith.constant 0 : index
    %c0_0 = arith.constant 0 : index
    %0 = vector.load %arg1[%c0, %c0_0] : memref<16x128xf32, #tpu.memory_space<vmem>>, vector<16x128xf32>
    %1 = arith.mulf %0, %0 : vector<16x128xf32>
    %c0_1 = arith.constant 0 : index
    %c0_2 = arith.constant 0 : index
    %2 = vector.load %arg2[%c0_1, %c0_2] : memref<128x128xf32, #tpu.memory_space<vmem>>, vector<128x128xf32>
    %cst = arith.constant dense<0.000000e+00> : vector<16x128xf32>
    %3 = tpu.matmul %1, %2, %cst {dimension_numbers = #tpu.dot_dimension_numbers<[1], [0], [0], [1], [0, 0, 1, 1], [], []>, precision = #tpu.contract_precision<fp32>} : vector<16x128xf32>, vector<128x128xf32>, vector<16x128xf32> -> vector<16x128xf32>
    %cst_3 = arith.constant 9.99999996E-13 : f32
    %4 = vector.broadcast %cst_3 : f32 to vector<16x128xf32>
    %5 = arith.maximumf %3, %4 : vector<16x128xf32>
    %6 = math.rsqrt %5 : vector<16x128xf32>
    %7 = arith.mulf %0, %6 : vector<16x128xf32>
    %c0_4 = arith.constant 0 : index
    %c0_5 = arith.constant 0 : index
    %8 = vector.load %arg3[%c0_4, %c0_5] : memref<16x128xf32, #tpu.memory_space<vmem>>, vector<16x128xf32>
    tpu.vector_store %arg3[%c0_4, %c0_5], %7 {strides = array<i32>} : memref<16x128xf32, #tpu.memory_space<vmem>>, vector<16x128xf32>,
    return
  }
  func.func @transform_0(%arg0: i32) -> (i32, i32) {
    %c0_i32 = arith.constant 0 : i32
    %c0_i32_0 = arith.constant 0 : i32
    return %arg0, %c0_i32 : i32, i32
  }
  func.func @transform_1(%arg0: i32) -> (i32, i32) {
    %c0_i32 = arith.constant 0 : i32
    %c0_i32_0 = arith.constant 0 : i32
    %c0_i32_1 = arith.constant 0 : i32
    return %c0_i32, %c0_i32_0 : i32, i32
  }
  func.func @transform_2(%arg0: i32) -> (i32, i32) {
    %c0_i32 = arith.constant 0 : i32
    %c0_i32_0 = arith.constant 0 : i32
    return %arg0, %c0_i32 : i32, i32
  }
}

</mosaic_0001>

<bundles_post_ra>
// kernel: tpu_custom_call.1
= control target key start
LH: loop header
LB: loop body
LE: loop exit
PB: predicated region body
PF: predicated region fallthrough
CT: control target
= control target key end

     0   :  { %7 = vsyncpa [#allocation3], 0  ;;  %s853_s0 = inlined_call_operand.hbm [shape: f32[16,128], index: 0, kind: input, shape index: {}]   ;;  %s854_s1 = inlined_call_operand.hbm [shape: f32[128,128], index: 1, kind: input, shape index: {}]   ;;  %s855_s2 = inlined_call_operand.hbm [shape: f32[16,128], index: 2, kind: output, shape index: {}]  }
   0x1   :  { %8 = vsyncpa [#allocation6], 0 }
   0x2   :  { %9 = vsyncpa [#allocation4], 0  ;;  %s14_s11 = sshll.u32 %s853_s0, 4  ;;  %s601_s12 = smov [#allocation2]   ;;  %s15_s11 = int_to_ptr.hbm [resolvable:$true] %s14_s11 }
   0x3   :  { %s16_s13 = sshll.u32 %s601_s12, 4  ;;  %s27_s16 = sshll.u32 %s854_s1, 4  ;;  %s17_s13 = int_to_ptr.vmem [resolvable:$true] %s16_s13  ;;  %s28_s16 = int_to_ptr.hbm [resolvable:$true] %s27_s16 }
   0x4   :  { %s602_s17 = smov 128   ;;  %s603_s18 = smov 8  }
   0x5   :  { %22 = dma.hbm_to_vmem [thread:$0]  %s15_s11, 256, %s17_s13, [#allocation3], %s602_s17, %s602_s17, %s603_s18  }
   0x6   :  { %s604_s19 = smov [#allocation5]  }
   0x7   :  { %s29_s20 = sshll.u32 %s604_s19, 4  ;;  %s30_s20 = int_to_ptr.vmem [resolvable:$true] %s29_s20 }
   0x8   :  { %35 = dma.hbm_to_vmem [thread:$0]  %s28_s16, 2048, %s30_s20, [#allocation6], %s602_s17, %s602_s17, %s603_s18  }
   0x9   :  { %595 = dma.done.wait [#allocation3], 256  }
   0xa   :  { %596 = vsyncadd [#allocation3], 4294967040 }
   0xb   :  { %597 = dma.done.wait [#allocation6], 2048  }
   0xc   :  { %598 = vsyncadd [#allocation6], 4294965248  ;;  %v63_v0 = vld [vmem:[#allocation5 + $0x78] sm:$0xff]  ;;  %v62_v1 = vld [vmem:[#allocation5 + $0x70] sm:$0xff]  ;;  %s605_s0 = smov [#allocation7]   ;;  %s468_s23 = sshll.u32 %s855_s2, 4  ;;  %s469_s23 = int_to_ptr.hbm [resolvable:$true] %s468_s23 }
   0xd   :  { %v61_v2 = vld [vmem:[#allocation5 + $0x68] sm:$0xff]  ;;  %v633_v3 = vand.u32 4294901760, %v63_v0  ;;  %v635_v4 = vand.u32 4294901760, %v62_v1  ;;  %v60_v6 = vld [vmem:[#allocation5 + $0x60] sm:$0xff]  ;;  %v59_v7 = vld [vmem:[#allocation5 + $0x58] sm:$0xff]  ;;  %s466_s1 = sshll.u32 %s605_s0, 4  ;;  %s467_s1 = int_to_ptr.vmem [resolvable:$true] %s466_s1 }
   0xe   :  { %v637_v5 = vand.u32 4294901760, %v61_v2  ;;  %v58_v8 = vld [vmem:[#allocation5 + $0x50] sm:$0xff]  ;;  %v639_v9 = vand.u32 4294901760, %v60_v6  ;;  %v641_v10 = vand.u32 4294901760, %v59_v7  ;;  %v57_v12 = vld [vmem:[#allocation5 + $0x48] sm:$0xff]  ;;  %v56_v13 = vld [vmem:[#allocation5 + $0x40] sm:$0xff] }
   0xf   :  { %v643_v11 = vand.u32 4294901760, %v58_v8  ;;  %65 = vmatpush.msra.mxu0 %v633_v3  ;;  %v114_v14 = vsub.f32 %v63_v0, %v633_v3  ;;  %v120_v15 = vsub.f32 %v62_v1, %v635_v4  ;;  %278 = vmatpush.msra.mxu3 %v633_v3  ;;  %v650_v17 = vand.u32 4294901760, %v57_v12  ;;  %v55_v18 = vld [vmem:[#allocation5 + $0x38] sm:$0xff]  ;;  %v54_v26 = vld [vmem:[#allocation5 + $0x30] sm:$0xff]  ;;  %v53_v36 = vld [vmem:[#allocation5 + $0x28] sm:$0xff] }
  0x10   :  { %v126_v16 = vsub.f32 %v61_v2, %v637_v5  ;;  %v132_v19 = vsub.f32 %v60_v6, %v639_v9  ;;  %v138_v20 = vsub.f32 %v59_v7, %v641_v10  ;;  %v654_v21 = vand.u32 4294901760, %v56_v13  ;;  %v52_v42 = vld [vmem:[#allocation5 + $0x20] sm:$0xff]  ;;  %v51_v48 = vld [vmem:[#allocation5 + $0x18] sm:$0xff]  ;;  %v50_v54 = vld [vmem:[#allocation5 + $0x10] sm:$0xff] }
  0x11   :  { %67 = vmatpush.msra.mxu0 %v635_v4  ;;  %220 = vmatpush.msra.mxu2 %v114_v14  ;;  %v657_v22 = vand.u32 4294901760, %v114_v14  ;;  %v659_v23 = vand.u32 4294901760, %v120_v15  ;;  %v144_v25 = vsub.f32 %v58_v8, %v643_v11  ;;  %v150_v28 = vsub.f32 %v57_v12, %v650_v17  ;;  %v49_v60 = vld [vmem:[#allocation5 + $0x8] sm:$0xff]  ;;  %v48_v2 = vld [vmem:[#allocation5] sm:$0xff] }
  0x12   :  { %v661_v24 = vand.u32 4294901760, %v126_v16  ;;  %280 = vmatpush.msra.mxu3 %v635_v4  ;;  %v665_v27 = vand.u32 4294901760, %v132_v19  ;;  %v668_v29 = vand.u32 4294901760, %v55_v18  ;;  %v674_v33 = vand.u32 4294901760, %v138_v20 }
  0x13   :  { %69 = vmatpush.msra.mxu0 %v637_v5  ;;  %223 = vmatpush.msra.mxu2 %v120_v15  ;;  %v116_v30 = vsub.f32 %v114_v14, %v657_v22  ;;  %v122_v31 = vsub.f32 %v120_v15, %v659_v23  ;;  %v156_v34 = vsub.f32 %v56_v13, %v654_v21  ;;  %v678_v35 = vand.u32 4294901760, %v54_v26 }
  0x14   :  { %v128_v32 = vsub.f32 %v126_v16, %v661_v24  ;;  %282 = vmatpush.msra.mxu3 %v637_v5  ;;  %v134_v39 = vsub.f32 %v132_v19, %v665_v27  ;;  %v682_v40 = vand.u32 4294901760, %v144_v25  ;;  %v685_v41 = vand.u32 4294901760, %v150_v28 }
  0x15   :  { %71 = vmatpush.msra.mxu0 %v639_v9  ;;  %226 = vmatpush.msra.mxu2 %v126_v16  ;;  %v117_v37 = vand.u32 4294901760, %v116_v30  ;;  %v123_v38 = vand.u32 4294901760, %v122_v31  ;;  %v140_v44 = vsub.f32 %v138_v20, %v674_v33  ;;  %v162_v45 = vsub.f32 %v55_v18, %v668_v29 }
  0x16   :  { %284 = vmatpush.msra.mxu3 %v639_v9  ;;  %v129_v43 = vand.u32 4294901760, %v128_v32  ;;  %v690_v46 = vand.u32 4294901760, %v53_v36  ;;  %v693_v47 = vand.u32 4294901760, %v156_v34  ;;  %v135_v49 = vand.u32 4294901760, %v134_v39 }
  0x17   :  { %73 = vmatpush.msra.mxu0 %v641_v10  ;;  %118 = vmatpush.msra.mxu1 %v117_v37  ;;  %v146_v50 = vsub.f32 %v144_v25, %v682_v40  ;;  %v168_v51 = vsub.f32 %v54_v26, %v678_v35  ;;  %v698_v52 = vand.u32 4294901760, %v52_v42  ;;  %v152_v53 = vsub.f32 %v150_v28, %v685_v41 }
  0x18   :  { %229 = vmatpush.msra.mxu2 %v132_v19  ;;  %286 = vmatpush.msra.mxu3 %v641_v10  ;;  %v141_v55 = vand.u32 4294901760, %v140_v44  ;;  %v174_v56 = vsub.f32 %v53_v36, %v690_v46  ;;  %v704_v57 = vand.u32 4294901760, %v51_v48  ;;  %v706_v58 = vand.u32 4294901760, %v162_v45 }
  0x19   :  { %75 = vmatpush.msra.mxu0 %v643_v11  ;;  %124 = vmatpush.msra.mxu1 %v123_v38  ;;  %v158_v59 = vsub.f32 %v156_v34, %v693_v47  ;;  %v147_v61 = vand.u32 4294901760, %v146_v50  ;;  %v180_v62 = vsub.f32 %v52_v42, %v698_v52  ;;  %v712_v63 = vand.u32 4294901760, %v50_v54 }
  0x1a   :  { %232 = vmatpush.msra.mxu2 %v138_v20  ;;  %288 = vmatpush.msra.mxu3 %v643_v11  ;;  %v714_v0 = vand.u32 4294901760, %v168_v51  ;;  %v153_v1 = vand.u32 4294901760, %v152_v53  ;;  %v164_v6 = vsub.f32 %v162_v45, %v706_v58  ;;  %v186_v7 = vsub.f32 %v51_v48, %v704_v57  ;;  %v766_v53 = vld [vmem:[#allocation2 + $0x8] sm:$0xff] }
  0x1b   :  { %77 = vmatpush.msra.mxu0 %v650_v17  ;;  %130 = vmatpush.msra.mxu1 %v129_v43  ;;  %v720_v8 = vand.u32 4294901760, %v49_v60  ;;  %v722_v12 = vand.u32 4294901760, %v174_v56  ;;  %v159_v13 = vand.u32 4294901760, %v158_v59  ;;  %v192_v15 = vsub.f32 %v50_v54, %v712_v63 }
  0x1c   :  { %235 = vmatpush.msra.mxu2 %v144_v25  ;;  %290 = vmatpush.msra.mxu3 %v650_v17  ;;  %v170_v14 = vsub.f32 %v168_v51, %v714_v0  ;;  %v728_v16 = vand.u32 4294901760, %v48_v2  ;;  %v730_v18 = vand.u32 4294901760, %v180_v62  ;;  %v165_v19 = vand.u32 4294901760, %v164_v6 }
  0x1d   :  { %79 = vmatpush.msra.mxu0 %v654_v21  ;;  %136 = vmatpush.msra.mxu1 %v135_v49  ;;  %v176_v20 = vsub.f32 %v174_v56, %v722_v12  ;;  %v198_v25 = vsub.f32 %v49_v60, %v720_v8  ;;  %v736_v26 = vand.u32 4294901760, %v186_v7 }
  0x1e   :  { %238 = vmatpush.msra.mxu2 %v150_v28  ;;  %292 = vmatpush.msra.mxu3 %v654_v21  ;;  %v738_v28 = vld [vmem:[#allocation2] sm:$0xff]  ;;  %v171_v30 = vand.u32 4294901760, %v170_v14  ;;  %v182_v31 = vsub.f32 %v180_v62, %v730_v18  ;;  %v204_v32 = vsub.f32 %v48_v2, %v728_v16 }
  0x1f   :  { %81 = vmatpush.msra.mxu0 %v668_v29  ;;  %142 = vmatpush.msra.mxu1 %v141_v55  ;;  %v46_v36 = vmul.f32 %v738_v28, %v738_v28  ;;  %v177_v37 = vand.u32 4294901760, %v176_v20  ;;  %v188_v38 = vsub.f32 %v186_v7, %v736_v26  ;;  %v751_v39 = vand.u32 4294901760, %v198_v25 }
  0x20   :  { %241 = vmatpush.msra.mxu2 %v156_v34  ;;  %294 = vmatpush.msra.mxu3 %v668_v29  ;;  %v744_v34 = vand.u32 4294901760, %v192_v15  ;;  %v183_v42 = vand.u32 4294901760, %v182_v31  ;;  %v756_v44 = vand.u32 4294901760, %v204_v32 }
  0x21   :  { %83 = vmatpush.msra.mxu0 %v678_v35  ;;  %148 = vmatpush.msra.mxu1 %v147_v61  ;;  %v189_v48 = vand.u32 4294901760, %v188_v38  ;;  %v200_v49 = vsub.f32 %v198_v25, %v751_v39 }
  0x22   :  { %244 = vmatpush.msra.mxu2 %v162_v45  ;;  %296 = vmatpush.msra.mxu3 %v678_v35  ;;  %v194_v43 = vsub.f32 %v192_v15, %v744_v34  ;;  %v759_v45 = vand.u32 4294901760, %v46_v36 }
  0x23   :  { %85 = vmatpush.msra.mxu0 %v690_v46  ;;  %154 = vmatpush.msra.mxu1 %v153_v1  ;;  %v201_v55 = vand.u32 4294901760, %v200_v49 }
  0x24   :  { %247 = vmatpush.msra.mxu2 %v168_v51  ;;  %298 = vmatpush.msra.mxu3 %v690_v46  ;;  %v195_v50 = vand.u32 4294901760, %v194_v43  ;;  %v206_v51 = vsub.f32 %v204_v32, %v756_v44  ;;  %v97_v54 = vsub.f32 %v46_v36, %v759_v45 }
  0x25   :  { %87 = vmatpush.msra.mxu0 %v698_v52  ;;  %160 = vmatpush.msra.mxu1 %v159_v13 }
  0x26   :  { %250 = vmatpush.msra.mxu2 %v174_v56  ;;  %300 = vmatpush.msra.mxu3 %v698_v52  ;;  %v47_v56 = vmul.f32 %v766_v53, %v766_v53  ;;  %v207_v59 = vand.u32 4294901760, %v206_v51  ;;  %v98_v60 = vand.u32 4294901760, %v97_v54 }
  0x27   :  { %89 = vmatpush.msra.mxu0 %v704_v57  ;;  %166 = vmatpush.msra.mxu1 %v165_v19 }
  0x28   :  { %253 = vmatpush.msra.mxu2 %v180_v62  ;;  %302 = vmatpush.msra.mxu3 %v704_v57  ;;  %v780_v61 = vand.u32 4294901760, %v47_v56 }
  0x29   :  { %91 = vmatpush.msra.mxu0 %v712_v63  ;;  %172 = vmatpush.msra.mxu1 %v171_v30 }
  0x2a   :  { %256 = vmatpush.msra.mxu2 %v186_v7  ;;  %304 = vmatpush.msra.mxu3 %v712_v63 }
  0x2b   :  { %93 = vmatpush.msra.mxu0 %v720_v8  ;;  %178 = vmatpush.msra.mxu1 %v177_v37 }
  0x2c   :  { %259 = vmatpush.msra.mxu2 %v192_v15  ;;  %306 = vmatpush.msra.mxu3 %v720_v8 }
  0x2d   :  { %95 = vmatpush.msra.mxu0 %v728_v16  ;;  %184 = vmatpush.msra.mxu1 %v183_v42 }
  0x2e   :  { %262 = vmatpush.msra.mxu2 %v198_v25  ;;  %308 = vmatpush.msra.mxu3 %v728_v16 }
  0x2f   :  { %325 = vmatpush.msrb.mxu0 %v657_v22  ;;  %190 = vmatpush.msra.mxu1 %v189_v48 }
  0x30   :  { %265 = vmatpush.msra.mxu2 %v204_v32  ;;  %498 = vmatpush.msrb.mxu3 %v633_v3 }
  0x31   :  { %329 = vmatpush.msrb.mxu0 %v659_v23  ;;  %196 = vmatpush.msra.mxu1 %v195_v50 }
  0x32   :  { %482 = vmatpush.msrb.mxu2 %v657_v22  ;;  %499 = vmatpush.msrb.mxu3 %v635_v4  ;;  %v99_v22 = vsub.f32 %v97_v54, %v98_v60 }
  0x33   :  { %333 = vmatpush.msrb.mxu0 %v661_v24  ;;  %202 = vmatpush.msra.mxu1 %v201_v55 }
  0x34   :  { %483 = vmatpush.msrb.mxu2 %v659_v23  ;;  %500 = vmatpush.msrb.mxu3 %v637_v5  ;;  %v105_v23 = vsub.f32 %v47_v56, %v780_v61 }
  0x35   :  { %337 = vmatpush.msrb.mxu0 %v665_v27  ;;  %208 = vmatpush.msra.mxu1 %v207_v59 }
  0x36   :  { %484 = vmatpush.msrb.mxu2 %v661_v24  ;;  %501 = vmatpush.msrb.mxu3 %v639_v9 }
  0x37   :  { %341 = vmatpush.msrb.mxu0 %v674_v33  ;;  %396 = vmatpush.msrb.mxu1 %v633_v3  ;;  %v100_v3 = vand.u32 4294901760, %v99_v22 }
  0x38   :  { %485 = vmatpush.msrb.mxu2 %v665_v27  ;;  %502 = vmatpush.msrb.mxu3 %v641_v10 }
  0x39   :  { %345 = vmatpush.msrb.mxu0 %v682_v40  ;;  %398 = vmatpush.msrb.mxu1 %v635_v4  ;;  %v106_v4 = vand.u32 4294901760, %v105_v23 }
  0x3a   :  { %486 = vmatpush.msrb.mxu2 %v674_v33  ;;  %503 = vmatpush.msrb.mxu3 %v643_v11 }
  0x3b   :  { %349 = vmatpush.msrb.mxu0 %v685_v41  ;;  %400 = vmatpush.msrb.mxu1 %v637_v5  ;;  %v107_v5 = vsub.f32 %v105_v23, %v106_v4 }
  0x3c   :  { %487 = vmatpush.msrb.mxu2 %v682_v40  ;;  %101 = vmatmul.f32.vlgmr.msra.gmra.mxu0 %v100_v3 }
  0x3d   :  { %353 = vmatpush.msrb.mxu0 %v693_v47  ;;  %402 = vmatpush.msrb.mxu1 %v639_v9  ;;  %v108_v9 = vand.u32 4294901760, %v107_v5 }
  0x3e   :  { %488 = vmatpush.msrb.mxu2 %v685_v41  ;;  %504 = vmatpush.msrb.mxu3 %v650_v17 }
  0x3f   :  { %404 = vmatpush.msrb.mxu1 %v641_v10  ;;  %357 = vmatpush.msrb.mxu0 %v706_v58 }
  0x40   :  { %489 = vmatpush.msrb.mxu2 %v693_v47  ;;  %505 = vmatpush.msrb.mxu3 %v654_v21 }
  0x41   :  { %268 = vmatmul.f32.vlgmr.msra.gmra.mxu2 %v97_v54  ;;  %361 = vmatpush.msrb.mxu0 %v714_v0 }
  0x42   :  { %490 = vmatpush.msrb.mxu2 %v706_v58  ;;  %406 = vmatpush.msrb.mxu1 %v643_v11 }
  0x43   :  { %312 = vmatmul.f32.vlgmr.msra.gmra.mxu3 %v98_v60  ;;  %365 = vmatpush.msrb.mxu0 %v722_v12 }
  0x44   :  { %491 = vmatpush.msrb.mxu2 %v714_v0  ;;  %408 = vmatpush.msrb.mxu1 %v650_v17 }
  0x45   :  { %506 = vmatpush.msrb.mxu3 %v668_v29  ;;  %210 = vmatmul.f32.vlgmr.msra.gmra.mxu1 %v759_v45 }
  0x46   :  { %492 = vmatpush.msrb.mxu2 %v722_v12  ;;  %369 = vmatpush.msrb.mxu0 %v730_v18 }
  0x47   :  { %410 = vmatpush.msrb.mxu1 %v654_v21  ;;  %507 = vmatpush.msrb.mxu3 %v678_v35 }
  0x48   :  { %109 = vmatmul.f32.gmra.mxu0 %v108_v9  ;;  %493 = vmatpush.msrb.mxu2 %v730_v18 }
  0x49   :  { %373 = vmatpush.msrb.mxu0 %v736_v26  ;;  %412 = vmatpush.msrb.mxu1 %v668_v29 }
  0x4a   :  { %508 = vmatpush.msrb.mxu3 %v690_v46  ;;  %273 = vmatmul.f32.gmra.mxu2 %v105_v23 }
  0x4b   :  { %494 = vmatpush.msrb.mxu2 %v736_v26  ;;  %377 = vmatpush.msrb.mxu0 %v744_v34 }
  0x4c   :  { %414 = vmatpush.msrb.mxu1 %v678_v35  ;;  %509 = vmatpush.msrb.mxu3 %v698_v52 }
  0x4d   :  { %318 = vmatmul.f32.gmra.mxu3 %v106_v4  ;;  %495 = vmatpush.msrb.mxu2 %v744_v34 }
  0x4e   :  { %381 = vmatpush.msrb.mxu0 %v751_v39  ;;  %416 = vmatpush.msrb.mxu1 %v690_v46 }
  0x4f   :  { %510 = vmatpush.msrb.mxu3 %v704_v57  ;;  %214 = vmatmul.f32.gmra.mxu1 %v780_v61 }
  0x50   :  { %496 = vmatpush.msrb.mxu2 %v751_v39  ;;  %385 = vmatpush.msrb.mxu0 %v756_v44 }
  0x51   :  { %418 = vmatpush.msrb.mxu1 %v698_v52  ;;  %511 = vmatpush.msrb.mxu3 %v712_v63 }
  0x52   :  { %387 = vmatmul.f32.vlgmr.msrb.gmra.mxu0 %v759_v45  ;;  %497 = vmatpush.msrb.mxu2 %v756_v44 }
  0x53   :  { %420 = vmatpush.msrb.mxu1 %v704_v57  ;;  %512 = vmatpush.msrb.mxu3 %v720_v8 }
  0x54   :  { %391 = vmatmul.f32.vlgmr.msrb.gmra.mxu2 %v780_v61 }
  0x55   :  { %422 = vmatpush.msrb.mxu1 %v712_v63  ;;  %513 = vmatpush.msrb.mxu3 %v728_v16 }
  0x56   :  { %432 = vmatmul.f32.vlgmr.msrb.gmra.mxu3 %v780_v61 }
  0x57   :  { %424 = vmatpush.msrb.mxu1 %v720_v8 }
  0x59   :  { %426 = vmatpush.msrb.mxu1 %v728_v16 }
  0x5a   :  { %428 = vmatmul.f32.vlgmr.msrb.gmra.mxu1 %v759_v45 }
  0xb9   :  { %v102_v10 = vpop.f32.mrf.mxu0 }
  0xc2   :  { %v211_v11 = vpop.f32.mrf.mxu1 }
  0xc3   :  { %v212_v27 = vadd.f32 %v211_v11, %v102_v10 }
  0xc4   :  { %v269_v17 = vpop.f32.mrf.mxu2 }
  0xc5   :  { %v110_v24 = vpop.f32.mrf.mxu0  ;;  %v270_v40 = vadd.f32 %v269_v17, %v212_v27 }
  0xc6   :  { %v313_v21 = vpop.f32.mrf.mxu3 }
  0xc7   :  { %v314_v52 = vadd.f32 %v313_v21, %v270_v40 }
  0xcc   :  { %v215_v29 = vpop.f32.mrf.mxu1 }
  0xcd   :  { %v274_v33 = vpop.f32.mrf.mxu2  ;;  %v216_v35 = vadd.f32 %v215_v29, %v110_v24 }
  0xcf   :  { %v275_v46 = vadd.f32 %v274_v33, %v216_v35  ;;  %v388_v47 = vpop.f32.mrf.mxu0 }
  0xd0   :  { %v319_v41 = vpop.f32.mrf.mxu3  ;;  %v389_v57 = vadd.f32 %v388_v47, %v314_v52 }
  0xd1   :  { %v320_v58 = vadd.f32 %v319_v41, %v275_v46 }
  0xd7   :  { %v392_v62 = vpop.f32.mrf.mxu2  ;;  %v429_v63 = vpop.f32.mrf.mxu1 }
  0xd8   :  { %v393_v0 = vadd.f32 %v392_v62, %v320_v58  ;;  %v430_v1 = vadd.f32 %v429_v63, %v389_v57 }
  0xd9   :  { %v433_v2 = vpop.f32.mrf.mxu3 }
  0xda   :  { %v436_v6 = vmax.f32 %v430_v1, 1e-12  ;;  %v434_v7 = vadd.f32 %v433_v2, %v393_v0 }
  0xdc   :  { %519 = vrsqrt.f32 %v436_v6  ;;  %v437_v8 = vmax.f32 %v434_v7, 1e-12  ;;  %vm444_vm1 = vweird.f32 %v436_v6 }
  0xde   :  { %521 = vrsqrt.f32 %v437_v8  ;;  %vm454_vm4 = vweird.f32 %v437_v8 }
  0xe2   :  { %v520_v12 = vpop.eup %519 }
  0xe3   :  { %v439_v13 = vmul.f32 %v520_v12, %v436_v6  ;;  %vm445_vm0 = vweird.f32 %v520_v12 }
  0xe4   :  { %v522_v14 = vpop.eup %521  ;;  %vm446_vm3 = vmor %vm444_vm1, %vm445_vm0 }
  0xe5   :  { %v440_v15 = vmul.f32 %v520_v12, %v439_v13  ;;  %v449_v16 = vmul.f32 %v522_v14, %v437_v8  ;;  %vm455_vm2 = vweird.f32 %v522_v14 }
  0xe6   :  { %vm456_vm5 = vmor %vm454_vm4, %vm455_vm2 }
  0xe7   :  { %v441_v18 = vmul.f32 0.5, %v440_v15  ;;  %v450_v19 = vmul.f32 %v522_v14, %v449_v16 }
  0xe9   :  { %v442_v20 = vsub.f32 1.5, %v441_v18  ;;  %v451_v25 = vmul.f32 0.5, %v450_v19 }
  0xeb   :  { %v443_v26 = vmul.f32 %v520_v12, %v442_v20  ;;  %v452_v30 = vsub.f32 1.5, %v451_v25 }
  0xed   :  { %v453_v31 = vmul.f32 %v522_v14, %v452_v30  ;;  %v447_v32 = vsel %vm446_vm3, %v520_v12, %v443_v26 }
  0xee   :  { %v458_v34 = vmul.f32 %v447_v32, %v738_v28 }
  0xef   :  { %v457_v36 = vsel %vm456_vm5, %v522_v14, %v453_v31 }
  0xf0   :  { %v459_v37 = vmul.f32 %v457_v36, %v766_v53  ;;  %460 = vst [vmem:[#allocation7] sm:$0xff] %v458_v34 }
  0xf2   :  { %461 = vst [vmem:[#allocation7 + $0x8] sm:$0xff] %v459_v37 }
  0xf3   :  { %474 = dma.vmem_to_hbm [thread:$0]  %s467_s1, 256, %s469_s23, [#allocation4], %s602_s17, %s602_s17, %s603_s18  }
  0xf4   :  { %599 = dma.done.wait [#allocation4], 256  }
  0xf5   :  { %600 = vsyncadd [#allocation4], 4294967040 }
  0xf6   :  { %479 = vsyncpa [#allocation3], 1 }
  0xf7   :  { %480 = vsyncpa [#allocation6], 1 }
  0xf8   :  { %481 = vsyncpa [#allocation4], 1 }

</bundles_post_ra>
